<compile_context>
chip_gen: v7x
topology: tpu7x:2x2x1
jax: 0.10.0
libtpu: 0.0.40
codegen_flags: <defaults>
</compile_context>

<pallas_src>
import jax
import jax.numpy as jnp
from jax.experimental import pallas as pl
from jax.experimental.pallas import tpu as pltpu

_LANE = 128
_TARGET_TILE_BYTES = 8 * 1024 * 1024     # ~8 MiB of streamed x per grid step
_MIN_SPLIT_BYTES = (3 << 20) // 2        # >1.5 MiB total => force >=2 grid steps


def _lr_kernel(x_ref, w_ref, b_ref, o_ref):
    # x_ref: (TB, D) native dtype | w_ref: (1, D) f32, resident
    # b_ref: (1,) f32 in SMEM    | o_ref: (TB, 1) f32
    x = x_ref[...].astype(jnp.float32)              # in-VMEM cast, matches x.float()
    w = w_ref[...]                                  # (1, D): sublane-broadcast vregs
    acc = jnp.sum(x * w, axis=-1, keepdims=True)    # VPU mul + XLU lane reduce
    o_ref[...] = acc + b_ref[0]                     # scalar bias add from SMEM


def _round_up(v, m):
    return ((v + m - 1) // m) * m


def _vmem_capacity_bytes():
    try:
        return int(pltpu.get_tpu_info().vmem_capacity_bytes)
    except Exception:
        return 64 * 1024 * 1024          # v7x-safe conservative fallback


def _per_row_vmem_bytes(D, itemsize):
    d_pad = _round_up(D, _LANE)
    return (2 * d_pad * itemsize         # x tile, double-buffered, lane-padded
            + 2 * d_pad * 4              # f32 cast + x*w temporaries allowance
            + 2 * _LANE * 4)             # (TB, 1) out tile (lane-padded), 2 bufs


def _fixed_vmem_bytes(D):
    d_pad = _round_up(D, _LANE)
    return 8 * d_pad * 4 + (2 << 20)     # resident weight row + slack/headroom


def _choose_block_b(B, D, x_dtype):
    """Pick a batch tile from the real VMEM footprint + HBM-step amortization."""
    itemsize = jnp.dtype(x_dtype).itemsize
    row_align = max(8, 32 // max(itemsize, 1))       # 8 f32 / 16 bf16 / 32 int8
    stream_row = max(D * itemsize, 1)                # HBM bytes moved per row

    vmem_budget = (_vmem_capacity_bytes() * 3) // 4  # ~25% headroom
    vmem_row = _per_row_vmem_bytes(D, itemsize)
    avail = max(vmem_budget - _fixed_vmem_bytes(D), vmem_row)

    bb_target = max(1, _TARGET_TILE_BYTES // stream_row)
    bb_vmem = max(row_align, avail // vmem_row)
    block_b = min(B, bb_target, bb_vmem)

    # Mid-sized inputs: force >=2 (up to 4) grid steps so megacore + pipelining
    # have work even when a single tile would fit.
    total = B * stream_row
    if total > _MIN_SPLIT_BYTES:
        steps = int(max(2, min(4, total // (1 << 20))))
        block_b = min(block_b, -(-B // steps))
    return int(block_b)


def _vmem_limit_bytes(block_b, D, itemsize, row_align):
    bb_pad = _round_up(block_b, row_align)
    plan = bb_pad * _per_row_vmem_bytes(D, itemsize) + _fixed_vmem_bytes(D)
    budget = (_vmem_capacity_bytes() * 3) // 4
    return int(min(budget, max(plan, 32 * 1024 * 1024)))


def lr_forward(x, weight, bias, *, block_b=None):
    """Linear regression forward pass.

    x:      (B, D) any float/int dtype (cast to f32 in-kernel, like x.float())
    weight: (1, D) float32   (PyTorch nn.Linear weight layout)
    bias:   (1,)   float32
    returns (B, 1) float32
    """
    B, D = x.shape
    itemsize = jnp.dtype(x.dtype).itemsize
    row_align = max(8, 32 // max(itemsize, 1))

    w_row = weight.astype(jnp.float32).reshape(1, D)     # lane-dense, VMEM-resident
    b1 = bias.astype(jnp.float32).reshape(1)             # scalar in SMEM

    if block_b is None:
        block_b = _choose_block_b(B, D, x.dtype)
    block_b = int(min(block_b, B))
    if block_b < B:
        # Tiled path: rows per tile must respect the dtype's sublane packing.
        block_b = max(row_align, (block_b // row_align) * row_align)

    grid = (pl.cdiv(B, block_b),)   # ragged last block handled by Pallas masking
    vmem_limit = _vmem_limit_bytes(block_b, D, itemsize, row_align)

    return pl.pallas_call(
        _lr_kernel,
        out_shape=jax.ShapeDtypeStruct((B, 1), jnp.float32),
        grid_spec=pltpu.PrefetchScalarGridSpec(
            num_scalar_prefetch=0,
            grid=grid,
            in_specs=[
                pl.BlockSpec((block_b, D), lambda i: (i, 0)),        # x tile (native dtype)
                pl.BlockSpec((1, D), lambda i: (0, 0)),              # weight, resident
                pl.BlockSpec(memory_space=pltpu.MemorySpace.SMEM),   # bias scalar
            ],
            out_specs=pl.BlockSpec((block_b, 1), lambda i: (i, 0)),
        ),
        compiler_params=pltpu.CompilerParams(
            dimension_semantics=("parallel",),
            vmem_limit_bytes=vmem_limit,
        ),
    )(x, w_row, b1)


if __name__ == "__main__":
    key = jax.random.PRNGKey(0)
    k_x, k_w, k_b, k_x2, k_w2, k_b2 = jax.random.split(key, 6)

    # --- Test 1: small f32 input, single block ---------------------------------
    batch, input_size = 8, 32
    bound = 1.0 / jnp.sqrt(jnp.float32(input_size))
    weight = jax.random.uniform(k_w, (1, input_size), jnp.float32, -bound, bound)
    bias = jax.random.uniform(k_b, (1,), jnp.float32, -bound, bound)
    x = jax.random.normal(k_x, (batch, input_size), jnp.float32)

    y = jax.block_until_ready(lr_forward(x, weight, bias))
    y_ref = x.astype(jnp.float32) @ weight.T + bias
    assert y.shape == (batch, 1)
    assert jnp.allclose(y, y_ref, atol=1e-5, rtol=1e-5)

    # --- Test 2: bf16 input, tiled grid with a ragged last block ----------------
    batch2, input_size2 = 20, 128
    bound2 = 1.0 / jnp.sqrt(jnp.float32(input_size2))
    weight2 = jax.random.uniform(k_w2, (1, input_size2), jnp.float32, -bound2, bound2)
    bias2 = jax.random.uniform(k_b2, (1,), jnp.float32, -bound2, bound2)
    x2 = jax.random.normal(k_x2, (batch2, input_size2), jnp.float32).astype(jnp.bfloat16)

    y2 = jax.block_until_ready(lr_forward(x2, weight2, bias2, block_b=16))
    y2_ref = x2.astype(jnp.float32) @ weight2.T + bias2
    assert y2.shape == (batch2, 1)
    assert jnp.allclose(y2, y2_ref, atol=1e-4, rtol=1e-4)

    print("KERNEL_OK")
</pallas_src>

<mosaic_0001>
module attributes {stable_mosaic.version = 11 : i64} {
  func.func @_lr_kernel(%arg0: i32, %arg1: memref<8x32xf32, #tpu.memory_space<vmem>>, %arg2: memref<1x32xf32, #tpu.memory_space<vmem>>, %arg3: memref<1xf32, #tpu.memory_space<smem>>, %arg4: memref<8x1xf32, #tpu.memory_space<vmem>>) attributes {dimension_semantics = [#tpu.dimension_semantics<parallel>], iteration_bounds = array<i64: 1>, scalar_prefetch = 0 : i64, scratch_operands = 0 : i64, tpu.core_type = #tpu.core_type<tc>, window_params = [{transform_indices = @transform_0, window_bounds = array<i64: 8, 32>}, {pipeline_mode = #tpu.pipeline_mode<synchronous>, transform_indices = @transform_1, window_bounds = array<i64: 1, 32>}, {transform_indices = @transform_2, window_bounds = array<i64: 1>}, {transform_indices = @transform_3, window_bounds = array<i64: 8, 1>}]} {
    %c0 = arith.constant 0 : index
    %c0_0 = arith.constant 0 : index
    %0 = vector.load %arg1[%c0, %c0_0] : memref<8x32xf32, #tpu.memory_space<vmem>>, vector<8x32xf32>
    %c0_1 = arith.constant 0 : index
    %c0_2 = arith.constant 0 : index
    %1 = vector.load %arg2[%c0_1, %c0_2] : memref<1x32xf32, #tpu.memory_space<vmem>>, vector<1x32xf32>
    %2 = vector.broadcast %1 : vector<1x32xf32> to vector<8x32xf32>
    %3 = arith.mulf %0, %2 : vector<8x32xf32>
    %cst = arith.constant dense<0.000000e+00> : vector<8xf32>
    %4 = vector.multi_reduction <add>, %3, %cst [1] : vector<8x32xf32> to vector<8xf32>
    %5 = vector.shape_cast %4 : vector<8xf32> to vector<8x1xf32>
    %c0_3 = arith.constant 0 : index
    %6 = memref.load %arg3[%c0_3] : memref<1xf32, #tpu.memory_space<smem>>
    %7 = vector.broadcast %6 : f32 to vector<8x1xf32>
    %8 = arith.addf %5, %7 : vector<8x1xf32>
    %c0_4 = arith.constant 0 : index
    %c0_5 = arith.constant 0 : index
    %9 = vector.load %arg4[%c0_4, %c0_5] : memref<8x1xf32, #tpu.memory_space<vmem>>, vector<8x1xf32>
    tpu.vector_store %arg4[%c0_4, %c0_5], %8 {strides = array<i32>} : memref<8x1xf32, #tpu.memory_space<vmem>>, vector<8x1xf32>,
    return
  }
  func.func @transform_0(%arg0: i32) -> (i32, i32) {
    %c0_i32 = arith.constant 0 : i32
    %c0_i32_0 = arith.constant 0 : i32
    return %arg0, %c0_i32 : i32, i32
  }
  func.func @transform_1(%arg0: i32) -> (i32, i32) {
    %c0_i32 = arith.constant 0 : i32
    %c0_i32_0 = arith.constant 0 : i32
    %c0_i32_1 = arith.constant 0 : i32
    return %c0_i32, %c0_i32_0 : i32, i32
  }
  func.func @transform_2(%arg0: i32) -> i32 {
    %c0_i32 = arith.constant 0 : i32
    %c0_i32_0 = arith.constant 0 : i32
    return %c0_i32 : i32
  }
  func.func @transform_3(%arg0: i32) -> (i32, i32) {
    %c0_i32 = arith.constant 0 : i32
    %c0_i32_0 = arith.constant 0 : i32
    return %arg0, %c0_i32 : i32, i32
  }
}

</mosaic_0001>

<bundles_post_ra>
// kernel: tpu_custom_call.1
= control target key start
LH: loop header
LB: loop body
LE: loop exit
PB: predicated region body
PF: predicated region fallthrough
CT: control target
= control target key end

     0   :  { %9 = vsyncpa [#allocation4], 0  ;;  %s76_s12 = smov [#allocation3]   ;;  %s118_s0 = inlined_call_operand.hbm [shape: f32[8,32], index: 0, kind: input, shape index: {}]   ;;  %s119_s1 = inlined_call_operand.vmem [shape: f32[1,32], index: 1, kind: input, shape index: {}]   ;;  %s120_s2 = inlined_call_operand.<no memory space> [shape: f32[1], index: 2, kind: input, shape index: {}]   ;;  %s121_s3 = inlined_call_operand.vmem [shape: f32[8,1], index: 3, kind: output, shape index: {}]  }
   0x1   :  { %s16_s13 = sshll.u32 %s76_s12, 4  ;;  %s52_s16 = scalar_lea.hbm %s118_s0, 128  ;;  %s17_s13 = int_to_ptr.vmem [resolvable:$true] %s16_s13 }
   0x2   :  { %p53_p0 = scmp.ne.s32.totalorder %s118_s0, %s52_s16  ;;  %p56_p1 = scmp.lt.u32.totalorder %s52_s16, %s118_s0 }
   0x4   :  { %p58_p2 = pnand %p56_p1, %p53_p0 }
   0x6   :  { %61 = shalt.err (!%p58_p2)
}
   0x7   :  { %s62_s21 = scalar_lea.vmem %s17_s13, 128  ;;  %p67_p4 = scmp.lt.s32.totalorder %s17_s13, %s17_s13 }
   0x8   :  { %p63_p3 = scmp.ne.s32.totalorder %s17_s13, %s62_s21  ;;  %p68_p5 = scmp.lt.s32.totalorder %s62_s21, %s62_s21 }
   0xa   :  { %p69_p6 = por %p68_p5, %p67_p4 }
   0xc   :  { %p70_p7 = pnand %p69_p6, %p63_p3 }
   0xe   :  { %73 = shalt.err (!%p70_p7)
}
   0xf   :  { %19 = dma.hbm_to_vmem [thread:$0]  %s118_s0, 128, %s17_s13, [#allocation4]  }
  0x10   :  { %74 = dma.done.wait [#allocation4], 128  }
  0x11   :  { %75 = vsyncadd [#allocation4], 4294967168  ;;  %v27_v0 = vld [vmem:[#allocation3] sm:$0xff]  ;;  %vm36_vm0 = vcmask 261120   ;;  %v41_v4 = vstv %s120_s2  ;;  %vm43_vm1 = vcmask 7168  }
  0x12   :  { %v50_v1 = vld [vmem:[%s119_s1] ss:$0 sm:$0xff] }
  0x13   :  { %v35_v2 = vmul.f32 %v50_v1, %v27_v0 }
  0x15   :  { %v37_v3 = vsel %vm36_vm0, %v35_v2, 0.0 }
  0x16   :  { %38 = vadd.xlane.f32.xlu0 %v37_v3 }
  0xa3   :  { %v39_v5 = vpop.xlane.xlu0 %38 }
  0xa4   :  { %v42_v6 = vadd.f32 %v41_v4, %v39_v5 }
  0xa6   :  { %44 = vst.msk [vmem:[%s121_s3] sm:$0xff] %vm43_vm1, %v42_v6 }
  0xa7   :  { %49 = vsyncpa [#allocation4], 1 }

</bundles_post_ra>
